<compile_context>
chip_gen: v6e
topology: v6e:2x2x1
jax: 0.10.0
libtpu: 0.0.40
codegen_flags: <defaults>
</compile_context>

<pallas_src>
import jax
import jax.numpy as jnp
from jax.experimental import pallas as pl
from jax.experimental.pallas import tpu as pltpu

SEQ_LEN = 7
DATA_DIM = 8                          # len(columns_used_in_training)
IN_FEATURES = SEQ_LEN * DATA_DIM      # 56
HIDDEN = 16

# lhs (M, K) x rhs (N, K) -> (M, N): contract the last dim of both operands.
_TRANS_B_DIM_NUMBERS = (((1,), (1,)), ((), ()))


def _round_up(n, m):
    return ((n + m - 1) // m) * m


def _leaky_relu(x, slope=0.2):
    return jnp.where(x >= 0, x, slope * x)


def _sigmoid(x):
    # Stable sigmoid via tanh (EUP); exact identity sigmoid(x)=0.5*(tanh(x/2)+1).
    return 0.5 * (jnp.tanh(0.5 * x) + 1.0)


def discriminator_kernel(x_ref, w1_ref, b1_ref, w2_ref, b2_ref, w3_ref, b3_ref,
                         o_ref):
    # x_ref: (TN, 56) f32, batch on sublanes exactly as it sits in HBM.

    # Linear(56 -> 16) + LeakyReLU(0.2)   (Dropout = identity in eval).
    # w1 @ x.T via a transposed-rhs dot_general: the on-chip relayout puts the
    # batch tile on the lane axis; the MXU N dim = TN is fully lane-dense.
    h1 = jax.lax.dot_general(w1_ref[...], x_ref[...], _TRANS_B_DIM_NUMBERS,
                             preferred_element_type=jnp.float32)
    h1 = _leaky_relu(h1 + b1_ref[...])                        # (16, TN) f32

    # Linear(16 -> 16) + LeakyReLU(0.2)
    h2 = jnp.dot(w2_ref[...], h1, preferred_element_type=jnp.float32)
    h2 = _leaky_relu(h2 + b2_ref[...])                        # (16, TN) f32

    # Linear(16 -> 1) + Sigmoid, on the VPU/XLU (an M=1 MXU pass is ~0%
    # utilized): weighted sublane-sum of h2 with the w3 column.
    h3 = jnp.sum(h2 * w3_ref[...], axis=0, keepdims=True) + b3_ref[...]
    o_ref[...] = _sigmoid(h3).astype(o_ref.dtype)             # (1, TN)


def _choose_tiling(B, *, tn_max=8192, min_tiles=2):
    """Batch-tile size (multiple of 128) and grid length.

    >=2 tiles whenever B allows it (v7x megacore + pipeline overlap); tile
    capped at tn_max so the per-step working set fits scoped VMEM on v5e.
    """
    b128 = _round_up(max(B, 1), 128)
    n_target = max(min_tiles, pl.cdiv(b128, tn_max))
    tn = min(tn_max, max(128, _round_up(pl.cdiv(b128, n_target), 128)))
    n_tiles = pl.cdiv(max(B, 1), tn)
    return tn, n_tiles


def discriminator_forward(x, params, *, tn_max=8192):
    """x: (B, seq_len, data_dim) float32 -> (B, 1) float32."""
    B = x.shape[0]
    w1, b1, w2, b2, w3, b3 = params            # W: (out, in), b: (out, 1)

    x2d = x.reshape(B, IN_FEATURES).astype(jnp.float32)   # free row-major view
    w3_col = w3.T                                          # (16, 1), tiny

    tn, n_tiles = _choose_tiling(B, tn_max=tn_max)

    out = pl.pallas_call(
        discriminator_kernel,
        out_shape=jax.ShapeDtypeStruct((1, B), jnp.float32),
        grid=(n_tiles,),
        in_specs=[
            pl.BlockSpec((tn, IN_FEATURES), lambda i: (i, 0)),   # x tile
            pl.BlockSpec(w1.shape, lambda i: (0, 0)),
            pl.BlockSpec(b1.shape, lambda i: (0, 0)),
            pl.BlockSpec(w2.shape, lambda i: (0, 0)),
            pl.BlockSpec(b2.shape, lambda i: (0, 0)),
            pl.BlockSpec(w3_col.shape, lambda i: (0, 0)),
            pl.BlockSpec(b3.shape, lambda i: (0, 0)),
        ],
        out_specs=pl.BlockSpec((1, tn), lambda i: (0, i)),       # lane-dense
        compiler_params=pltpu.CompilerParams(
            dimension_semantics=("parallel",),
            vmem_limit_bytes=32 * 1024 * 1024),
    )(x2d, w1, b1, w2, b2, w3_col, b3)

    return out.reshape(B, 1)


def discriminator_reference(x, params):
    """Pure-JAX f32 reference matching the torch module (eval mode)."""
    w1, b1, w2, b2, w3, b3 = params
    h = x.reshape(x.shape[0], -1)
    h = _leaky_relu(h @ w1.T + b1.T)
    h = _leaky_relu(h @ w2.T + b2.T)
    return _sigmoid(h @ w3.T + b3.T)


def init_params(key):
    """Deterministic init mimicking nn.Linear's U(-1/sqrt(fan_in), 1/sqrt(fan_in)).

    Weights stored (out_features, in_features); biases stored (out_features, 1)."""
    ks = jax.random.split(key, 6)

    def linear(kw, kb, fan_in, fan_out):
        bound = 1.0 / jnp.sqrt(jnp.float32(fan_in))
        w = jax.random.uniform(kw, (fan_out, fan_in), jnp.float32, -bound, bound)
        b = jax.random.uniform(kb, (fan_out, 1), jnp.float32, -bound, bound)
        return w, b

    w1, b1 = linear(ks[0], ks[1], IN_FEATURES, HIDDEN)
    w2, b2 = linear(ks[2], ks[3], HIDDEN, HIDDEN)
    w3, b3 = linear(ks[4], ks[5], HIDDEN, 1)
    return (w1, b1, w2, b2, w3, b3)


if __name__ == "__main__":
    key = jax.random.PRNGKey(0)
    k_params, k_x, k_x2 = jax.random.split(key, 3)

    params = init_params(k_params)

    # Small canonical example (batch=2), as implied by the module.
    batch = 2
    x = jax.random.normal(k_x, (batch, SEQ_LEN, DATA_DIM), jnp.float32)
    out = jax.block_until_ready(discriminator_forward(x, params))
    assert out.shape == (batch, 1), out.shape
    assert bool(jnp.all((out >= 0.0) & (out <= 1.0)))
    ref = discriminator_reference(x, params)
    max_err = float(jnp.max(jnp.abs(out - ref)))
    assert max_err < 1e-2, f"mismatch vs reference (batch=2): {max_err}"

    # Exercise the multi-tile + ragged-batch path (grid=(2,), last block partial).
    batch2 = 333
    x2 = jax.random.normal(k_x2, (batch2, SEQ_LEN, DATA_DIM), jnp.float32)
    out2 = jax.block_until_ready(discriminator_forward(x2, params))
    assert out2.shape == (batch2, 1), out2.shape
    ref2 = discriminator_reference(x2, params)
    max_err2 = float(jnp.max(jnp.abs(out2 - ref2)))
    assert max_err2 < 1e-2, f"mismatch vs reference (batch=333): {max_err2}"

    print("KERNEL_OK")
</pallas_src>

<mosaic_0001>
module attributes {stable_mosaic.version = 11 : i64} {
  func.func @discriminator_kernel(%arg0: i32, %arg1: memref<128x56xf32, #tpu.memory_space<vmem>>, %arg2: memref<16x56xf32, #tpu.memory_space<vmem>>, %arg3: memref<16x1xf32, #tpu.memory_space<vmem>>, %arg4: memref<16x16xf32, #tpu.memory_space<vmem>>, %arg5: memref<16x1xf32, #tpu.memory_space<vmem>>, %arg6: memref<16x1xf32, #tpu.memory_space<vmem>>, %arg7: memref<1x1xf32, #tpu.memory_space<vmem>>, %arg8: memref<1x128xf32, #tpu.memory_space<vmem>>) attributes {dimension_semantics = [#tpu.dimension_semantics<parallel>], iteration_bounds = array<i64: 1>, scalar_prefetch = 0 : i64, scratch_operands = 0 : i64, tpu.core_type = #tpu.core_type<tc>, window_params = [{transform_indices = @transform_0, window_bounds = array<i64: 128, 56>}, {pipeline_mode = #tpu.pipeline_mode<synchronous>, transform_indices = @transform_1, window_bounds = array<i64: 16, 56>}, {pipeline_mode = #tpu.pipeline_mode<synchronous>, transform_indices = @transform_2, window_bounds = array<i64: 16, 1>}, {pipeline_mode = #tpu.pipeline_mode<synchronous>, transform_indices = @transform_3, window_bounds = array<i64: 16, 16>}, {pipeline_mode = #tpu.pipeline_mode<synchronous>, transform_indices = @transform_4, window_bounds = array<i64: 16, 1>}, {pipeline_mode = #tpu.pipeline_mode<synchronous>, transform_indices = @transform_5, window_bounds = array<i64: 16, 1>}, {pipeline_mode = #tpu.pipeline_mode<synchronous>, transform_indices = @transform_6, window_bounds = array<i64: 1, 1>}, {transform_indices = @transform_7, window_bounds = array<i64: 1, 128>}]} {
    %c0 = arith.constant 0 : index
    %c0_0 = arith.constant 0 : index
    %0 = vector.load %arg2[%c0, %c0_0] : memref<16x56xf32, #tpu.memory_space<vmem>>, vector<16x56xf32>
    %c0_1 = arith.constant 0 : index
    %c0_2 = arith.constant 0 : index
    %1 = vector.load %arg1[%c0_1, %c0_2] : memref<128x56xf32, #tpu.memory_space<vmem>>, vector<128x56xf32>
    %cst = arith.constant dense<0.000000e+00> : vector<16x128xf32>
    %2 = tpu.matmul %0, %1, %cst {dimension_numbers = #tpu.dot_dimension_numbers<[1], [1], [0], [0], [0, 0, 1, 0], [], []>} : vector<16x56xf32>, vector<128x56xf32>, vector<16x128xf32> -> vector<16x128xf32>
    %c0_3 = arith.constant 0 : index
    %c0_4 = arith.constant 0 : index
    %3 = vector.load %arg3[%c0_3, %c0_4] : memref<16x1xf32, #tpu.memory_space<vmem>>, vector<16x1xf32>
    %4 = vector.broadcast %3 : vector<16x1xf32> to vector<16x128xf32>
    %5 = arith.addf %2, %4 : vector<16x128xf32>
    %cst_5 = arith.constant 0.000000e+00 : f32
    %6 = vector.broadcast %cst_5 : f32 to vector<16x128xf32>
    %7 = arith.cmpf oge, %5, %6 : vector<16x128xf32>
    %cst_6 = arith.constant 2.000000e-01 : f32
    %8 = vector.broadcast %cst_6 : f32 to vector<16x128xf32>
    %9 = arith.mulf %8, %5 : vector<16x128xf32>
    %10 = arith.select %7, %5, %9 : vector<16x128xi1>, vector<16x128xf32>
    %c0_7 = arith.constant 0 : index
    %c0_8 = arith.constant 0 : index
    %11 = vector.load %arg4[%c0_7, %c0_8] : memref<16x16xf32, #tpu.memory_space<vmem>>, vector<16x16xf32>
    %cst_9 = arith.constant dense<0.000000e+00> : vector<16x128xf32>
    %12 = tpu.matmul %11, %10, %cst_9 {dimension_numbers = #tpu.dot_dimension_numbers<[1], [0], [0], [1], [0, 0, 1, 1], [], []>} : vector<16x16xf32>, vector<16x128xf32>, vector<16x128xf32> -> vector<16x128xf32>
    %c0_10 = arith.constant 0 : index
    %c0_11 = arith.constant 0 : index
    %13 = vector.load %arg5[%c0_10, %c0_11] : memref<16x1xf32, #tpu.memory_space<vmem>>, vector<16x1xf32>
    %14 = vector.broadcast %13 : vector<16x1xf32> to vector<16x128xf32>
    %15 = arith.addf %12, %14 : vector<16x128xf32>
    %cst_12 = arith.constant 0.000000e+00 : f32
    %16 = vector.broadcast %cst_12 : f32 to vector<16x128xf32>
    %17 = arith.cmpf oge, %15, %16 : vector<16x128xf32>
    %cst_13 = arith.constant 2.000000e-01 : f32
    %18 = vector.broadcast %cst_13 : f32 to vector<16x128xf32>
    %19 = arith.mulf %18, %15 : vector<16x128xf32>
    %20 = arith.select %17, %15, %19 : vector<16x128xi1>, vector<16x128xf32>
    %c0_14 = arith.constant 0 : index
    %c0_15 = arith.constant 0 : index
    %21 = vector.load %arg6[%c0_14, %c0_15] : memref<16x1xf32, #tpu.memory_space<vmem>>, vector<16x1xf32>
    %22 = vector.broadcast %21 : vector<16x1xf32> to vector<16x128xf32>
    %23 = arith.mulf %20, %22 : vector<16x128xf32>
    %cst_16 = arith.constant dense<0.000000e+00> : vector<128xf32>
    %24 = vector.multi_reduction <add>, %23, %cst_16 [0] : vector<16x128xf32> to vector<128xf32>
    %25 = vector.shape_cast %24 : vector<128xf32> to vector<1x128xf32>
    %c0_17 = arith.constant 0 : index
    %c0_18 = arith.constant 0 : index
    %26 = vector.load %arg7[%c0_17, %c0_18] : memref<1x1xf32, #tpu.memory_space<vmem>>, vector<1x1xf32>
    %27 = vector.broadcast %26 : vector<1x1xf32> to vector<1x128xf32>
    %28 = arith.addf %25, %27 : vector<1x128xf32>
    %cst_19 = arith.constant 5.000000e-01 : f32
    %29 = vector.broadcast %cst_19 : f32 to vector<1x128xf32>
    %30 = arith.mulf %29, %28 : vector<1x128xf32>
    %31 = math.tanh %30 : vector<1x128xf32>
    %cst_20 = arith.constant 1.000000e+00 : f32
    %32 = vector.broadcast %cst_20 : f32 to vector<1x128xf32>
    %33 = arith.addf %31, %32 : vector<1x128xf32>
    %cst_21 = arith.constant 5.000000e-01 : f32
    %34 = vector.broadcast %cst_21 : f32 to vector<1x128xf32>
    %35 = arith.mulf %34, %33 : vector<1x128xf32>
    %c0_22 = arith.constant 0 : index
    %c0_23 = arith.constant 0 : index
    %36 = vector.load %arg8[%c0_22, %c0_23] : memref<1x128xf32, #tpu.memory_space<vmem>>, vector<1x128xf32>
    tpu.vector_store %arg8[%c0_22, %c0_23], %35 {strides = array<i32>} : memref<1x128xf32, #tpu.memory_space<vmem>>, vector<1x128xf32>,
    return
  }
  func.func @transform_0(%arg0: i32) -> (i32, i32) {
    %c0_i32 = arith.constant 0 : i32
    %c0_i32_0 = arith.constant 0 : i32
    return %arg0, %c0_i32 : i32, i32
  }
  func.func @transform_1(%arg0: i32) -> (i32, i32) {
    %c0_i32 = arith.constant 0 : i32
    %c0_i32_0 = arith.constant 0 : i32
    %c0_i32_1 = arith.constant 0 : i32
    return %c0_i32, %c0_i32_0 : i32, i32
  }
  func.func @transform_2(%arg0: i32) -> (i32, i32) {
    %c0_i32 = arith.constant 0 : i32
    %c0_i32_0 = arith.constant 0 : i32
    %c0_i32_1 = arith.constant 0 : i32
    return %c0_i32, %c0_i32_0 : i32, i32
  }
  func.func @transform_3(%arg0: i32) -> (i32, i32) {
    %c0_i32 = arith.constant 0 : i32
    %c0_i32_0 = arith.constant 0 : i32
    %c0_i32_1 = arith.constant 0 : i32
    return %c0_i32, %c0_i32_0 : i32, i32
  }
  func.func @transform_4(%arg0: i32) -> (i32, i32) {
    %c0_i32 = arith.constant 0 : i32
    %c0_i32_0 = arith.constant 0 : i32
    %c0_i32_1 = arith.constant 0 : i32
    return %c0_i32, %c0_i32_0 : i32, i32
  }
  func.func @transform_5(%arg0: i32) -> (i32, i32) {
    %c0_i32 = arith.constant 0 : i32
    %c0_i32_0 = arith.constant 0 : i32
    %c0_i32_1 = arith.constant 0 : i32
    return %c0_i32, %c0_i32_0 : i32, i32
  }
  func.func @transform_6(%arg0: i32) -> (i32, i32) {
    %c0_i32 = arith.constant 0 : i32
    %c0_i32_0 = arith.constant 0 : i32
    %c0_i32_1 = arith.constant 0 : i32
    return %c0_i32, %c0_i32_0 : i32, i32
  }
  func.func @transform_7(%arg0: i32) -> (i32, i32) {
    %c0_i32 = arith.constant 0 : i32
    %c0_i32_0 = arith.constant 0 : i32
    return %c0_i32, %arg0 : i32, i32
  }
}

</mosaic_0001>

<bundles_post_ra>
// kernel: tpu_custom_call.1
= control target key start
LH: loop header
LB: loop body
LE: loop exit
PB: predicated region body
PF: predicated region fallthrough
CT: control target
= control target key end

     0   :  { %s622_s0 = inlined_call_operand.vmem [shape: f32[2,56], index: 0, kind: input, shape index: {}]   ;;  %s623_s1 = inlined_call_operand.vmem [shape: f32[16,56], index: 1, kind: input, shape index: {}]   ;;  %s624_s2 = inlined_call_operand.vmem [shape: f32[16,1], index: 2, kind: input, shape index: {}]   ;;  %s625_s3 = inlined_call_operand.vmem [shape: f32[16,16], index: 3, kind: input, shape index: {}]   ;;  %s626_s4 = inlined_call_operand.vmem [shape: f32[16,1], index: 4, kind: input, shape index: {}]   ;;  %s627_s5 = inlined_call_operand.vmem [shape: f32[16,1], index: 5, kind: input, shape index: {}]   ;;  %s628_s6 = inlined_call_operand.<no memory space> [shape: f32[1,1], index: 6, kind: input, shape index: {}]   ;;  %s629_s7 = inlined_call_operand.hbm [shape: f32[1,2], index: 7, kind: output, shape index: {}]  }
   0x1   :  { %v12_v0 = vstv %s628_s6 }
   0x2   :  { %13 = vst [vmem:[#allocation2] sm:$0x1] %v12_v0 }
   0x3   :  { %v46_v1 = vld [vmem:[%s622_s0 + $0x78] sm:$0xff]  ;;  %vm59_vm0 = vcmask 457728   ;;  %v45_v2 = vld [vmem:[%s622_s0 + $0x70] sm:$0xff]  ;;  %v460_v3 = vmov 0   ;;  %v44_v4 = vld [vmem:[%s622_s0 + $0x68] sm:$0xff] }
   0x4   :  { %390 = vmatprep.subr.msk.mxu0 %vm59_vm0, %v46_v1  ;;  %434 = vset.pattern.permute.xlu0 %v460_v3  ;;  %v29_v5 = vld [vmem:[%s623_s1] sm:$0xff]  ;;  %v48_v6 = vld [vmem:[%s624_s2 + $0x8] sm:$0xff] }
   0x5   :  { %391 = vmatpush3.xpose.msk.msra.mxu0 %vm59_vm0, %v46_v1  ;;  %435 = vset.pattern.permute.xlu1 %v460_v3 }
   0x6   :  { %392 = vmatprep.subr.msk.mxu0 %vm59_vm0, %v45_v2  ;;  %422 = vmatprep.mubr.msk.f32.mxu0 %vm59_vm0, %v29_v5 }
   0x7   :  { %56 = vperm.xlu0 %434, %v48_v6  }
   0x9   :  { %393 = vmatpush3.xpose.msk.msra.mxu0 %vm59_vm0, %v45_v2 }
   0xa   :  { %394 = vmatprep.subr.msk.mxu0 %vm59_vm0, %v44_v4 }
   0xb   :  { %14 = vsyncpa [#allocation4], 0  ;;  %v43_v7 = vld [vmem:[%s622_s0 + $0x60] sm:$0xff]  ;;  %v42_v9 = vld [vmem:[%s622_s0 + $0x58] sm:$0xff]  ;;  %vm209_vm1 = vcmask 130048   ;;  %v324_v53 = vlaneseq }
   0xc   :  { %v47_v8 = vld [vmem:[%s624_s2] sm:$0xff]  ;;  %v41_v11 = vld [vmem:[%s622_s0 + $0x50] sm:$0xff]  ;;  %v40_v13 = vld [vmem:[%s622_s0 + $0x48] sm:$0xff] }
   0xd   :  { %395 = vmatpush3.xpose.msk.msra.mxu0 %vm59_vm0, %v44_v4  ;;  %51 = vperm.xlu0 %434, %v47_v8   ;;  %v297_v10 = vld [vmem:[%s627_s5] sm:$0xff]  ;;  %v38_v15 = vld [vmem:[%s622_s0 + $0x38] sm:$0xff]  ;;  %v37_v16 = vld [vmem:[%s622_s0 + $0x30] sm:$0xff]  ;;  %v325_v56 = vshrl.u32 %v324_v53, 7 }
   0xe   :  { %396 = vmatprep.subr.msk.mxu0 %vm59_vm0, %v43_v7  ;;  %v318_v12 = vld [vmem:[#allocation2] sm:$0x1]  ;;  %v36_v17 = vld [vmem:[%s622_s0 + $0x28] sm:$0xff]  ;;  %v34_v19 = vld [vmem:[%s622_s0 + $0x18] sm:$0xff] }
   0xf   :  { %v39_v14 = vld [vmem:[%s622_s0 + $0x40] sm:$0xff]  ;;  %v33_v20 = vld [vmem:[%s622_s0 + $0x10] sm:$0xff]  ;;  %v32_v21 = vld [vmem:[%s622_s0 + $0x8] sm:$0xff]  ;;  %v326_v59 = vsub.s32 0, %v325_v56 }
  0x10   :  { %v35_v18 = vld [vmem:[%s622_s0 + $0x20] sm:$0xff]  ;;  %v30_v23 = vld [vmem:[%s623_s1 + $0x8] sm:$0xff] }
  0x11   :  { %397 = vmatpush3.xpose.msk.msra.mxu0 %vm59_vm0, %v43_v7  ;;  %301 = vperm.xlu0 %434, %v297_v10   ;;  %v31_v22 = vld [vmem:[%s622_s0] sm:$0xff]  ;;  %v198_v26 = vld [vmem:[%s626_s4 + $0x8] sm:$0xff] }
  0x12   :  { %398 = vmatprep.subr.msk.mxu0 %vm59_vm0, %v42_v9  ;;  %v195_v24 = vld [vmem:[%s625_s3] sm:$0xff]  ;;  %v298_v27 = vld [vmem:[%s627_s5 + $0x8] sm:$0xff] }
  0x13   :  { %429 = vmatprep.mubr.msk.f32.mxu1 %vm209_vm1, %v195_v24  ;;  %v197_v25 = vld [vmem:[%s626_s4] sm:$0xff]  ;;  %v196_v38 = vld [vmem:[%s625_s3 + $0x8] sm:$0xff]  ;;  %s461_s3 = smov [#allocation3]  }
  0x14   :  { %201 = vperm.xlu1 %435, %v197_v25   ;;  %s340_s5 = sshll.u32 %s461_s3, 4  ;;  %s341_s5 = int_to_ptr.vmem [resolvable:$true] %s340_s5 }
  0x15   :  { %399 = vmatpush3.xpose.msk.msra.mxu0 %vm59_vm0, %v42_v9  ;;  %321 = vperm.xlu0 %434, %v318_v12   ;;  %s438_s25 = scalar_lea.vmem %s341_s5, 16  ;;  %s442_s26 = scalar_lea.vmem %s341_s5, 32 }
  0x16   :  { %400 = vmatprep.subr.msk.mxu0 %vm59_vm0, %v41_v11  ;;  %p439_p0 = scmp.ne.s32.totalorder %s341_s5, %s438_s25  ;;  %p443_p1 = scmp.lt.s32.totalorder %s341_s5, %s341_s5 }
  0x17   :  { %p444_p2 = scmp.lt.s32.totalorder %s442_s26, %s438_s25 }
  0x18   :  { %206 = vperm.xlu1 %435, %v198_v26  }
  0x19   :  { %401 = vmatpush3.xpose.msk.msra.mxu0 %vm59_vm0, %v41_v11  ;;  %p445_p3 = por %p444_p2, %p443_p1 }
  0x1a   :  { %402 = vmatprep.subr.msk.mxu0 %vm59_vm0, %v40_v13 }
  0x1b   :  { %p446_p4 = pnand %p445_p3, %p439_p0 }
  0x1c   :  { %306 = vperm.xlu1 %435, %v298_v27  }
  0x1d   :  { %403 = vmatpush3.xpose.msk.msra.mxu0 %vm59_vm0, %v40_v13 }
  0x1e   :  { %404 = vmatprep.subr.msk.mxu0 %vm59_vm0, %v39_v14 }
  0x21   :  { %405 = vmatpush3.xpose.msk.msra.mxu0 %vm59_vm0, %v39_v14 }
  0x22   :  { %406 = vmatprep.subr.msk.mxu0 %vm59_vm0, %v38_v15 }
  0x25   :  { %407 = vmatpush3.xpose.msk.msra.mxu0 %vm59_vm0, %v38_v15 }
  0x26   :  { %408 = vmatprep.subr.msk.mxu0 %vm59_vm0, %v37_v16 }
  0x29   :  { %409 = vmatpush3.xpose.msk.msra.mxu0 %vm59_vm0, %v37_v16 }
  0x2a   :  { %410 = vmatprep.subr.msk.mxu0 %vm59_vm0, %v36_v17 }
  0x2d   :  { %411 = vmatpush3.xpose.msk.msra.mxu0 %vm59_vm0, %v36_v17 }
  0x2e   :  { %412 = vmatprep.subr.msk.mxu0 %vm59_vm0, %v35_v18 }
  0x31   :  { %413 = vmatpush3.xpose.msk.msra.mxu0 %vm59_vm0, %v35_v18 }
  0x32   :  { %414 = vmatprep.subr.msk.mxu0 %vm59_vm0, %v34_v19 }
  0x35   :  { %415 = vmatpush3.xpose.msk.msra.mxu0 %vm59_vm0, %v34_v19 }
  0x36   :  { %416 = vmatprep.subr.msk.mxu0 %vm59_vm0, %v33_v20 }
  0x39   :  { %417 = vmatpush3.xpose.msk.msra.mxu0 %vm59_vm0, %v33_v20 }
  0x3a   :  { %418 = vmatprep.subr.msk.mxu0 %vm59_vm0, %v32_v21 }
  0x3d   :  { %419 = vmatpush3.xpose.msk.msra.mxu0 %vm59_vm0, %v32_v21 }
  0x3e   :  { %420 = vmatprep.subr.msk.mxu0 %vm59_vm0, %v31_v22 }
  0x41   :  { %421 = vmatpush3.xpose.msk.msra.mxu0 %vm59_vm0, %v31_v22 }
  0x44   :  { %423 = vmatmul.mubr.msk.f32.vlgmr.msra.gmra.mxu0 %vm59_vm0, %v30_v23 }
  0x82   :  { %v57_v28 = vpop.permute.xlu0 %56 }
  0x88   :  { %v52_v31 = vpop.permute.xlu0 %51 }
  0x8c   :  { %v302_v48 = vpop.permute.xlu0 %301 }
  0x8f   :  { %v202_v39 = vpop.permute.xlu1 %201 }
  0x90   :  { %v322_v61 = vpop.permute.xlu0 %321 }
  0x91   :  { %v327_v63 = vrot.slane %v322_v61, %v326_v59 }
  0x93   :  { %v207_v40 = vpop.permute.xlu1 %206 }
  0x97   :  { %v307_v49 = vpop.permute.xlu1 %306 }
 0x104   :  { %v424_v29 = vpop.f32.mrf.mxu0 }
 0x105   :  { %v186_v30 = vadd.f32 %v424_v29, %v57_v28 }
 0x106   :  { %v180_v32 = vpop.f32.mrf.mxu0 }
 0x107   :  { %v181_v33 = vadd.f32 %v180_v32, %v52_v31  ;;  %vm190_vm2 = vcmp.ge.f32.partialorder %v186_v30, 0.0  ;;  %v192_v34 = vmul.f32 0.2, %v186_v30 }
 0x109   :  { %v191_v35 = vmul.f32 0.2, %v181_v33  ;;  %v194_v36 = vsel %vm190_vm2, %v186_v30, %v192_v34  ;;  %vm189_vm3 = vcmp.ge.f32.partialorder %v181_v33, 0.0 }
 0x10a   :  { %425 = vmatprep.subr.mxu1 %v194_v36 }
 0x10b   :  { %426 = vmatpush3.msra.mxu1 %v194_v36  ;;  %v193_v37 = vsel %vm189_vm3, %v181_v33, %v191_v35 }
 0x10c   :  { %427 = vmatprep.subr.mxu1 %v193_v37 }
 0x10d   :  { %428 = vmatpush3.msra.mxu1 %v193_v37 }
 0x10e   :  { %430 = vmatmul.mubr.msk.f32.vlgmr.msra.gmra.mxu1 %vm209_vm1, %v196_v38 }
 0x1ce   :  { %v431_v41 = vpop.f32.mrf.mxu1 }
 0x1cf   :  { %v288_v42 = vadd.f32 %v431_v41, %v207_v40 }
 0x1d0   :  { %v282_v43 = vpop.f32.mrf.mxu1 }
 0x1d1   :  { %vm292_vm4 = vcmp.ge.f32.partialorder %v288_v42, 0.0  ;;  %v294_v44 = vmul.f32 0.2, %v288_v42  ;;  %v283_v45 = vadd.f32 %v282_v43, %v202_v39 }
 0x1d3   :  { %v296_v46 = vsel %vm292_vm4, %v288_v42, %v294_v44  ;;  %vm291_vm5 = vcmp.ge.f32.partialorder %v283_v45, 0.0  ;;  %v293_v47 = vmul.f32 0.2, %v283_v45 }
 0x1d4   :  { %v310_v51 = vmul.f32 %v307_v49, %v296_v46 }
 0x1d5   :  { %v295_v50 = vsel %vm291_vm5, %v283_v45, %v293_v47 }
 0x1d6   :  { %v309_v52 = vmul.f32 %v302_v48, %v295_v50 }
 0x1d8   :  { %v311_v54 = vadd.f32 %v310_v51, %v309_v52 }
 0x1da   :  { %v312_v55 = vrot.slane %v311_v54, 4 }
 0x1dc   :  { %v313_v57 = vadd.f32 %v312_v55, %v311_v54 }
 0x1de   :  { %v314_v58 = vrot.slane %v313_v57, 2 }
 0x1e0   :  { %v315_v60 = vadd.f32 %v314_v58, %v313_v57 }
 0x1e2   :  { %v316_v62 = vrot.slane %v315_v60, 1 }
 0x1e4   :  { %v317_v0 = vadd.f32 %v316_v62, %v315_v60 }
 0x1e6   :  { %v328_v1 = vadd.f32 %v327_v63, %v317_v0 }
 0x1e8   :  { %v329_v2 = vmul.f32 0.5, %v328_v1 }
 0x1ea   :  { %436 = vtanh.f32 %v329_v2 }
 0x1f7   :  { %v437_v3 = vpop.eup %436 }
 0x1f8   :  { %v331_v4 = vadd.f32 1.0, %v437_v3 }
 0x1fa   :  { %v332_v5 = vmul.f32 0.5, %v331_v4 }
 0x1fc   :  { %333 = vst [vmem:[#allocation3] sm:$0x1] %v332_v5 }
 0x1fd   :  { %449 = shalt.err (!%p446_p4)
}
 0x1fe   :  { %343 = dma.vmem_to_hbm [thread:$0]  %s341_s5, 16, %s629_s7, [#allocation4]  }
 0x1ff   :  { %458 = dma.done.wait [#allocation4], 16  }
 0x200   :  { %459 = vsyncadd [#allocation4], 4294967280 }
 0x201   :  { %347 = vsyncpa [#allocation4], 1 }

</bundles_post_ra>
